<compile_context>
chip_gen: v6e
topology: v6e:2x2x1
jax: 0.10.0
libtpu: 0.0.40
codegen_flags: <defaults>
</compile_context>

<pallas_src>
import functools
import math

import jax
import jax.numpy as jnp
from jax.experimental import pallas as pl
from jax.experimental.pallas import tpu as pltpu


def _round_up(x, m):
    return ((x + m - 1) // m) * m


def _gcn_layer_kernel(feak_ref, fear_ref, adj_ref, bias_ref, out_ref,
                      acc_ref, learn_ref, *, num_layers):
    """One grid step: (h col tile, layer l, row tile r, reduction tile k).

    feak_ref : (tk, h)      bf16  fea rows for reduction tile k (layer-0 operand)
    fear_ref : (tm, h)      f32   fea rows for row tile r (residual base)
    adj_ref  : (T, tm, tk)  bf16  pre-tiled VMEM-resident adjacency, OR
               (tm, tk)     i8/bf16 streamed adjacency tile
    bias_ref : (8, h)       f32   layer-l bias band (row 0 holds the bias)
    out_ref  : (N_pad, h)   f32   residual-averaged output (resident per h)
    acc_ref  : (tm, h)      f32   K-reduction accumulator (scratch)
    learn_ref: (2*N_pad, h) bf16  ping-pong learn state   (scratch)
    """
    l = pl.program_id(1)          # GNN layer (sequential dependency)
    r = pl.program_id(2)          # output row tile
    k = pl.program_id(3)          # reduction tile (innermost)
    num_r = pl.num_programs(2)
    num_k = pl.num_programs(3)

    n_pad = learn_ref.shape[0] // 2
    tm = acc_ref.shape[0]
    tk = feak_ref.shape[0]
    parity = l % 2

    # ---- adjacency tile -> bf16 MXU operand --------------------------------
    if len(adj_ref.shape) == 3:
        # VMEM-resident, pre-tiled (T, tm, tk): pure first-axis dynamic index,
        # DMA'd from HBM exactly once (constant BlockSpec index map).
        adj_tile = adj_ref[r * num_k + k]
    else:
        # Streamed (tm, tk) tile (int8 for 0/1 adjacency, else bf16).
        adj_tile = adj_ref[...]
    if adj_tile.dtype != jnp.bfloat16:
        # int8 -> f32 -> bf16; the cast hides under the tile DMA (mem-bound).
        adj_tile = adj_tile.astype(jnp.float32).astype(jnp.bfloat16)

    # ---- layer-l operand: streamed fea for layer 0, else bf16 learn state --
    read_start = pl.multiple_of(parity * n_pad + k * tk, 128)
    learn_slab = learn_ref[pl.ds(read_start, tk), :]        # (tk, h) bf16
    operand = jnp.where(l == 0, feak_ref[...], learn_slab)

    prod = jnp.dot(adj_tile, operand, preferred_element_type=jnp.float32)

    # ---- K reduction: direct assign at k==0, accumulate afterwards ---------
    @pl.when(k == 0)
    def _assign():
        acc_ref[...] = prod

    @pl.when(k > 0)
    def _accumulate():
        acc_ref[...] += prod

    # ---- end of K sweep: bias add, ping-pong write, residual update --------
    @pl.when(k == num_k - 1)
    def _finish():
        new_rows = acc_ref[...] + bias_ref[0:1, :]           # (tm, h) f32

        # learn_{l+1}: only needed if another layer will read it.
        @pl.when(l < num_layers - 1)
        def _store_learn():
            write_start = pl.multiple_of((1 - parity) * n_pad + r * tm, 128)
            learn_ref[pl.ds(write_start, tm), :] = new_rows.astype(jnp.bfloat16)

        # tmp update; residual base = fea at l==0, running sum otherwise.
        # The 1/(L+1) scale is folded into the last layer's finish so there is
        # no serial whole-slab epilogue pass.
        row0 = pl.multiple_of(r * tm, 128)
        prev = out_ref[pl.ds(row0, tm), :]                   # garbage at l==0,
        base = jnp.where(l == 0, fear_ref[...], prev)        # discarded by where
        scale = jnp.where(l == num_layers - 1, 1.0 / (num_layers + 1), 1.0)
        out_ref[pl.ds(row0, tm), :] = (base + new_rows) * scale


def gcn_layer_forward(fea, adj, biases, *, tile=512, adj_is_binary=True,
                      force_streamed=False):
    """fea: (N, H) f32, adj: (N, N) f32, biases: (L, H) f32 -> (N, H) f32.

    adj_is_binary: the adjacency only holds 0/1 (exact in int8 for the
    low-bandwidth streamed path).  Set False for weighted adjacencies (streams
    bf16 instead; the MXU path is bf16 either way).
    force_streamed: testing hook that disables VMEM residency of adj.
    """
    N, H = fea.shape
    L = int(biases.shape[0])
    assert adj.shape == (N, N) and L >= 1

    # ---- tiling (adaptive for small graphs, 512 for large ones) ------------
    H_pad = _round_up(H, 128)                      # lane-dense feature dim
    t = min(int(tile), _round_up(N, 128))
    t = max(128, (t // 128) * 128)                 # multiple of 128 rows/cols
    tm = tk = t
    N_pad = _round_up(N, t)
    num_r = N_pad // tm
    num_k = N_pad // tk

    # ---- generation-aware VMEM budget & adjacency residency gate -----------
    try:
        vmem_cap = int(pltpu.get_tpu_info().vmem_capacity_bytes)
    except Exception:                              # pragma: no cover
        vmem_cap = 64 * 2**20                      # conservative (v7x) fallback
    headroom = 4 * 2**20

    def _budget(resident, h_tile):
        b = 2 * tk * h_tile * 2                    # fea bf16 (k-keyed), dbl-buf
        b += 2 * tm * h_tile * 4                   # fea f32 (r-keyed), dbl-buf
        b += 2 * 8 * h_tile * 4                    # bias band
        b += 2 * N_pad * h_tile * 4                # resident out block (x2 cons.)
        b += tm * h_tile * 4                       # acc scratch
        b += 2 * N_pad * h_tile * 2                # learn ping-pong scratch
        if resident:
            b += 2 * N_pad * N_pad * 2             # resident bf16 adj (x2 cons.)
        else:
            b += 2 * tm * tk * (1 if adj_is_binary else 2)
        return b

    adj_resident = (not force_streamed) and (
        _budget(True, H_pad) <= vmem_cap - headroom)

    # Feature-column sharding (v7x megacore): columns of learn evolve
    # independently, so an outer "parallel" h axis is correctness-safe.  Only
    # enabled when adj is VMEM-resident so it does not multiply adj HBM traffic.
    h_tile = 128 if (adj_resident and H_pad > 128) else H_pad
    num_h = H_pad // h_tile

    need = _budget(adj_resident, h_tile)
    vmem_limit = int(max(16 * 2**20,
                         min(vmem_cap - headroom,
                             max(32 * 2**20, need + 4 * 2**20))))

    # ---- padded operands ----------------------------------------------------
    fea_f32 = jnp.zeros((N_pad, H_pad), jnp.float32).at[:N, :H].set(
        fea.astype(jnp.float32))
    fea_bf16 = fea_f32.astype(jnp.bfloat16)
    # Each layer's bias lives in row 0 of an (8, H_pad) band so the bias
    # BlockSpec can select layer l with a static, (8,128)-aligned block.
    bias_p = jnp.zeros((L, 8, H_pad), jnp.float32).at[:, 0, :H].set(
        biases.astype(jnp.float32)).reshape(L * 8, H_pad)

    if adj_resident:
        adj_p = jnp.zeros((N_pad, N_pad), jnp.bfloat16).at[:N, :N].set(
            adj.astype(jnp.bfloat16))
        # Pre-tile to (T, tm, tk) so the kernel only needs a first-axis dynamic
        # index (no lane-dim dynamic slicing) on the resident block.
        adj_in = adj_p.reshape(num_r, tm, num_k, tk).transpose(
            0, 2, 1, 3).reshape(num_r * num_k, tm, tk)
        adj_spec = pl.BlockSpec((num_r * num_k, tm, tk),
                                lambda h, l, r, k: (0, 0, 0))   # DMA'd once
    else:
        adj_dtype = jnp.int8 if adj_is_binary else jnp.bfloat16
        adj_in = jnp.zeros((N_pad, N_pad), adj_dtype).at[:N, :N].set(
            adj.astype(adj_dtype))
        adj_spec = pl.BlockSpec((tm, tk), lambda h, l, r, k: (r, k))

    grid = (num_h, L, num_r, num_k)
    kernel = functools.partial(_gcn_layer_kernel, num_layers=L)

    adj_bytes = (N_pad * N_pad * 2 if adj_resident
                 else num_h * L * N_pad * N_pad * (1 if adj_is_binary else 2))
    cost = pl.CostEstimate(
        flops=2 * L * N_pad * N_pad * H_pad,
        transcendentals=0,
        bytes_accessed=adj_bytes + L * N_pad * H_pad * 6 + N_pad * H_pad * 4)

    out_p = pl.pallas_call(
        kernel,
        out_shape=jax.ShapeDtypeStruct((N_pad, H_pad), jnp.float32),
        grid_spec=pltpu.PrefetchScalarGridSpec(
            num_scalar_prefetch=0,
            grid=grid,
            in_specs=[
                pl.BlockSpec((tk, h_tile), lambda h, l, r, k: (k, h)),  # fea bf16
                pl.BlockSpec((tm, h_tile), lambda h, l, r, k: (r, h)),  # fea f32
                adj_spec,                                               # adjacency
                pl.BlockSpec((8, h_tile), lambda h, l, r, k: (l, h)),   # bias_l
            ],
            out_specs=pl.BlockSpec((N_pad, h_tile), lambda h, l, r, k: (0, h)),
            scratch_shapes=[
                pltpu.VMEM((tm, h_tile), jnp.float32),           # K accumulator
                pltpu.VMEM((2 * N_pad, h_tile), jnp.bfloat16),   # learn ping-pong
            ]),
        compiler_params=pltpu.CompilerParams(
            # Only h may be parallel (independent feature columns).  The l/r/k
            # axes MUST stay sequential on one core: they share the learn
            # scratch and read-modify-write the resident out block.
            dimension_semantics=("parallel", "arbitrary", "arbitrary",
                                 "arbitrary"),
            vmem_limit_bytes=vmem_limit),
        cost_estimate=cost,
    )(fea_bf16, fea_f32, adj_in, bias_p)

    return out_p[:N, :H]


if __name__ == "__main__":
    # opt for GCNLayer: hidden_units, GNNL, dropout, leakey
    opt = {"hidden_units": 32, "GNNL": 3, "dropout": 0.1, "leakey": 0.2}
    H = opt["hidden_units"]
    L = opt["GNNL"]

    def reference(fea, adj, biases, bf16_matched):
        """Pure-JAX reference.  bf16_matched mirrors the kernel's MXU path
        (bf16 operands, f32 accumulation); otherwise exact f32."""
        learn = fea
        tmp = fea
        adj_bf = adj.astype(jnp.bfloat16)
        for i in range(biases.shape[0]):
            if bf16_matched:
                learn = jnp.dot(adj_bf, learn.astype(jnp.bfloat16),
                                preferred_element_type=jnp.float32) + biases[i]
            else:
                learn = adj @ learn + biases[i]
            tmp = tmp + learn
        return tmp / (biases.shape[0] + 1)

    def check(name, out, ref, tol):
        err = float(jnp.max(jnp.abs(out - ref)))
        scale = 1.0 + float(jnp.max(jnp.abs(ref)))
        assert err <= tol * scale, (
            f"{name}: max|out-ref|={err:g} exceeds {tol:g}*(1+max|ref|)={tol*scale:g}")

    def run_case(name, n_nodes, thresh, tile, force_streamed):
        key = jax.random.PRNGKey(0)
        k_fea, k_adj, k_w, k_b = jax.random.split(key, 4)
        fea = jax.random.normal(k_fea, (n_nodes, H), dtype=jnp.float32)
        adj = (jax.random.uniform(k_adj, (n_nodes, n_nodes)) > thresh).astype(
            jnp.float32)
        # Deterministic init mirroring GraphConvolution.reset_parameters:
        # uniform(-stdv, stdv), stdv = 1/sqrt(out_features).
        stdv = 1.0 / math.sqrt(H)
        # weight (L, H, H) is initialized as in __init__ but UNUSED in forward.
        _weights = jax.random.uniform(k_w, (L, H, H), jnp.float32, -stdv, stdv)
        biases = jax.random.uniform(k_b, (L, H), jnp.float32, -stdv, stdv)

        out = jax.block_until_ready(
            gcn_layer_forward(fea, adj, biases, tile=tile,
                              force_streamed=force_streamed))
        assert out.shape == (n_nodes, H) and out.dtype == jnp.float32
        check(name + "/bf16-matched", out, reference(fea, adj, biases, True), 2e-2)
        check(name + "/exact-f32", out, reference(fea, adj, biases, False), 1e-1)

    # Tiny graph (single tile) on both the VMEM-resident and int8-streamed
    # adjacency paths, then a multi-tile graph exercising the K reduction,
    # row tiling and the learn ping-pong across tiles.
    run_case("tiny-resident", 16, 0.7, 512, force_streamed=False)
    run_case("tiny-streamed", 16, 0.7, 512, force_streamed=True)
    run_case("multi-tile-resident", 300, 0.9, 128, force_streamed=False)
    run_case("multi-tile-streamed", 300, 0.9, 128, force_streamed=True)

    print("KERNEL_OK")
</pallas_src>

<mosaic_0001>
module attributes {stable_mosaic.version = 11 : i64} {
  func.func @_gcn_layer_kernel(%arg0: i32, %arg1: i32, %arg2: i32, %arg3: i32, %arg4: memref<128x128xbf16, #tpu.memory_space<vmem>>, %arg5: memref<128x128xf32, #tpu.memory_space<vmem>>, %arg6: memref<1x128x128xbf16, #tpu.memory_space<vmem>>, %arg7: memref<8x128xf32, #tpu.memory_space<vmem>>, %arg8: memref<128x128xf32, #tpu.memory_space<vmem>>, %arg9: memref<128x128xf32, #tpu.memory_space<vmem>>, %arg10: memref<256x128xbf16, #tpu.memory_space<vmem>>) attributes {dimension_semantics = [#tpu.dimension_semantics<parallel>, #tpu.dimension_semantics<arbitrary>, #tpu.dimension_semantics<arbitrary>, #tpu.dimension_semantics<arbitrary>], iteration_bounds = array<i64: 1, 3, 1, 1>, scalar_prefetch = 0 : i64, scratch_operands = 2 : i64, tpu.core_type = #tpu.core_type<tc>, window_params = [{transform_indices = @transform_0, window_bounds = array<i64: 128, 128>}, {transform_indices = @transform_1, window_bounds = array<i64: 128, 128>}, {pipeline_mode = #tpu.pipeline_mode<synchronous>, transform_indices = @transform_2, window_bounds = array<i64: 1, 128, 128>}, {transform_indices = @transform_3, window_bounds = array<i64: 8, 128>}, {transform_indices = @transform_4, window_bounds = array<i64: 128, 128>}]} {
    %c2_i32 = arith.constant 2 : i32
    %c0_i32 = arith.constant 0 : i32
    %0 = arith.cmpi eq, %c2_i32, %c0_i32 : i32
    %c1_i32 = arith.constant 1 : i32
    %1 = arith.select %0, %c1_i32, %c2_i32 : i32
    %2 = arith.remsi %arg1, %1 : i32
    %c0_i32_0 = arith.constant 0 : i32
    %3 = arith.cmpi ne, %2, %c0_i32_0 : i32
    %c0_i32_1 = arith.constant 0 : i32
    %4 = arith.cmpi slt, %2, %c0_i32_1 : i32
    %c0_i32_2 = arith.constant 0 : i32
    %5 = arith.cmpi slt, %1, %c0_i32_2 : i32
    %6 = arith.xori %4, %5 : i1
    %7 = arith.andi %6, %3 : i1
    %8 = arith.addi %2, %1 : i32
    %9 = arith.select %7, %8, %2 : i32
    %c1_i32_3 = arith.constant 1 : i32
    %10 = arith.muli %arg2, %c1_i32_3 : i32
    %11 = arith.addi %10, %arg3 : i32
    %12 = arith.index_cast %11 : i32 to index
    %c0 = arith.constant 0 : index
    %c0_4 = arith.constant 0 : index
    %13 = vector.load %arg6[%12, %c0, %c0_4] : memref<1x128x128xbf16, #tpu.memory_space<vmem>>, vector<1x128x128xbf16>
    %14 = vector.shape_cast %13 : vector<1x128x128xbf16> to vector<128x128xbf16>
    %c128_i32 = arith.constant 128 : i32
    %15 = arith.muli %9, %c128_i32 : i32
    %c128_i32_5 = arith.constant 128 : i32
    %16 = arith.muli %arg3, %c128_i32_5 : i32
    %17 = arith.addi %15, %16 : i32
    %18 = tpu.assume_multiple %17, 128 : i32
    %19 = arith.index_cast %18 : i32 to index
    %c0_6 = arith.constant 0 : index
    %20 = vector.load %arg10[%19, %c0_6] : memref<256x128xbf16, #tpu.memory_space<vmem>>, vector<128x128xbf16>
    %c0_i32_7 = arith.constant 0 : i32
    %21 = arith.cmpi eq, %arg1, %c0_i32_7 : i32
    %c0_8 = arith.constant 0 : index
    %c0_9 = arith.constant 0 : index
    %22 = vector.load %arg4[%c0_8, %c0_9] : memref<128x128xbf16, #tpu.memory_space<vmem>>, vector<128x128xbf16>
    %23 = arith.select %21, %22, %20 : vector<128x128xbf16>
    %cst = arith.constant dense<0.000000e+00> : vector<128x128xf32>
    %24 = tpu.matmul %14, %23, %cst {dimension_numbers = #tpu.dot_dimension_numbers<[1], [0], [0], [1], [0, 0, 1, 1], [], []>} : vector<128x128xbf16>, vector<128x128xbf16>, vector<128x128xf32> -> vector<128x128xf32>
    %c0_i32_10 = arith.constant 0 : i32
    %25 = arith.cmpi eq, %arg3, %c0_i32_10 : i32
    %26 = arith.extui %25 : i1 to i32
    %c0_i32_11 = arith.constant 0 : i32
    %27 = arith.cmpi ne, %26, %c0_i32_11 : i32
    scf.if %27 {
      %c0_16 = arith.constant 0 : index
      %c0_17 = arith.constant 0 : index
      %34 = vector.load %arg9[%c0_16, %c0_17] : memref<128x128xf32, #tpu.memory_space<vmem>>, vector<128x128xf32>
      tpu.vector_store %arg9[%c0_16, %c0_17], %24 {strides = array<i32>} : memref<128x128xf32, #tpu.memory_space<vmem>>, vector<128x128xf32>,
    } else {
    }
    %c0_i32_12 = arith.constant 0 : i32
    %28 = arith.cmpi sgt, %arg3, %c0_i32_12 : i32
    %29 = arith.extui %28 : i1 to i32
    %c0_i32_13 = arith.constant 0 : i32
    %30 = arith.cmpi ne, %29, %c0_i32_13 : i32
    scf.if %30 {
      %c0_16 = arith.constant 0 : index
      %c0_17 = arith.constant 0 : index
      %34 = vector.load %arg9[%c0_16, %c0_17] : memref<128x128xf32, #tpu.memory_space<vmem>>, vector<128x128xf32>
      %35 = arith.addf %34, %24 : vector<128x128xf32>
      %c0_18 = arith.constant 0 : index
      %c0_19 = arith.constant 0 : index
      %36 = vector.load %arg9[%c0_18, %c0_19] : memref<128x128xf32, #tpu.memory_space<vmem>>, vector<128x128xf32>
      tpu.vector_store %arg9[%c0_18, %c0_19], %35 {strides = array<i32>} : memref<128x128xf32, #tpu.memory_space<vmem>>, vector<128x128xf32>,
    } else {
    }
    %c0_i32_14 = arith.constant 0 : i32
    %31 = arith.cmpi eq, %arg3, %c0_i32_14 : i32
    %32 = arith.extui %31 : i1 to i32
    %c0_i32_15 = arith.constant 0 : i32
    %33 = arith.cmpi ne, %32, %c0_i32_15 : i32
    scf.if %33 {
      %c0_16 = arith.constant 0 : index
      %c0_17 = arith.constant 0 : index
      %34 = vector.load %arg9[%c0_16, %c0_17] : memref<128x128xf32, #tpu.memory_space<vmem>>, vector<128x128xf32>
      %c0_18 = arith.constant 0 : index
      %c0_19 = arith.constant 0 : index
      %35 = vector.load %arg7[%c0_18, %c0_19] : memref<8x128xf32, #tpu.memory_space<vmem>>, vector<1x128xf32>
      %36 = vector.broadcast %35 : vector<1x128xf32> to vector<128x128xf32>
      %37 = arith.addf %34, %36 : vector<128x128xf32>
      %c2_i32_20 = arith.constant 2 : i32
      %38 = arith.cmpi slt, %arg1, %c2_i32_20 : i32
      %39 = arith.extui %38 : i1 to i32
      %c0_i32_21 = arith.constant 0 : i32
      %40 = arith.cmpi ne, %39, %c0_i32_21 : i32
      scf.if %40 {
        %c1_i32_31 = arith.constant 1 : i32
        %55 = arith.subi %c1_i32_31, %9 : i32
        %c128_i32_32 = arith.constant 128 : i32
        %56 = arith.muli %55, %c128_i32_32 : i32
        %c128_i32_33 = arith.constant 128 : i32
        %57 = arith.muli %arg2, %c128_i32_33 : i32
        %58 = arith.addi %56, %57 : i32
        %59 = tpu.assume_multiple %58, 128 : i32
        %60 = arith.truncf %37 : vector<128x128xf32> to vector<128x128xbf16>
        %61 = arith.index_cast %59 : i32 to index
        %c0_34 = arith.constant 0 : index
        %62 = vector.load %arg10[%61, %c0_34] : memref<256x128xbf16, #tpu.memory_space<vmem>>, vector<128x128xbf16>
        tpu.vector_store %arg10[%61, %c0_34], %60 {strides = array<i32>} : memref<256x128xbf16, #tpu.memory_space<vmem>>, vector<128x128xbf16>,
      } else {
      }
      %c128_i32_22 = arith.constant 128 : i32
      %41 = arith.muli %arg2, %c128_i32_22 : i32
      %42 = tpu.assume_multiple %41, 128 : i32
      %43 = arith.index_cast %42 : i32 to index
      %c0_23 = arith.constant 0 : index
      %44 = vector.load %arg8[%43, %c0_23] : memref<128x128xf32, #tpu.memory_space<vmem>>, vector<128x128xf32>
      %c0_i32_24 = arith.constant 0 : i32
      %45 = arith.cmpi eq, %arg1, %c0_i32_24 : i32
      %c0_25 = arith.constant 0 : index
      %c0_26 = arith.constant 0 : index
      %46 = vector.load %arg5[%c0_25, %c0_26] : memref<128x128xf32, #tpu.memory_space<vmem>>, vector<128x128xf32>
      %47 = arith.select %45, %46, %44 : vector<128x128xf32>
      %c2_i32_27 = arith.constant 2 : i32
      %48 = arith.cmpi eq, %arg1, %c2_i32_27 : i32
      %cst_28 = arith.constant 2.500000e-01 : f32
      %cst_29 = arith.constant 1.000000e+00 : f32
      %49 = arith.select %48, %cst_28, %cst_29 : f32
      %50 = arith.addf %47, %37 : vector<128x128xf32>
      %51 = vector.broadcast %49 : f32 to vector<128x128xf32>
      %52 = arith.mulf %50, %51 : vector<128x128xf32>
      %53 = arith.index_cast %42 : i32 to index
      %c0_30 = arith.constant 0 : index
      %54 = vector.load %arg8[%53, %c0_30] : memref<128x128xf32, #tpu.memory_space<vmem>>, vector<128x128xf32>
      tpu.vector_store %arg8[%53, %c0_30], %52 {strides = array<i32>} : memref<128x128xf32, #tpu.memory_space<vmem>>, vector<128x128xf32>,
    } else {
    }
    return
  }
  func.func @transform_0(%arg0: i32, %arg1: i32, %arg2: i32, %arg3: i32) -> (i32, i32) {
    %c0_i32 = arith.constant 0 : i32
    return %arg3, %arg0 : i32, i32
  }
  func.func @transform_1(%arg0: i32, %arg1: i32, %arg2: i32, %arg3: i32) -> (i32, i32) {
    %c0_i32 = arith.constant 0 : i32
    return %arg2, %arg0 : i32, i32
  }
  func.func @transform_2(%arg0: i32, %arg1: i32, %arg2: i32, %arg3: i32) -> (i32, i32, i32) {
    %c0_i32 = arith.constant 0 : i32
    %c0_i32_0 = arith.constant 0 : i32
    %c0_i32_1 = arith.constant 0 : i32
    %c0_i32_2 = arith.constant 0 : i32
    return %c0_i32, %c0_i32_0, %c0_i32_1 : i32, i32, i32
  }
  func.func @transform_3(%arg0: i32, %arg1: i32, %arg2: i32, %arg3: i32) -> (i32, i32) {
    %c0_i32 = arith.constant 0 : i32
    return %arg1, %arg0 : i32, i32
  }
  func.func @transform_4(%arg0: i32, %arg1: i32, %arg2: i32, %arg3: i32) -> (i32, i32) {
    %c0_i32 = arith.constant 0 : i32
    %c0_i32_0 = arith.constant 0 : i32
    return %c0_i32, %arg0 : i32, i32
  }
}

</mosaic_0001>

<bundles_post_ra>
// kernel: tpu_custom_call.1
= control target key start
LH: loop header
LB: loop body
LE: loop exit
PB: predicated region body
PF: predicated region fallthrough
CT: control target
= control target key end

     0   :  { %9 = vsyncpa [#allocation5], 0  ;;  %s1871_s0 = inlined_call_operand.hbm [shape: bf16[128,128], index: 0, kind: input, shape index: {}]   ;;  %s1872_s1 = inlined_call_operand.hbm [shape: f32[128,128], index: 1, kind: input, shape index: {}]   ;;  %s1873_s2 = inlined_call_operand.hbm [shape: bf16[1,128,128], index: 2, kind: input, shape index: {}]   ;;  %s1874_s3 = inlined_call_operand.hbm [shape: f32[24,128], index: 3, kind: input, shape index: {}]   ;;  %s1875_s4 = inlined_call_operand.hbm [shape: f32[128,128], index: 4, kind: output, shape index: {}]  }
   0x1   :  { %10 = vsyncpa [#allocation8], 0 }
   0x2   :  { %11 = vsyncpa [#allocation11], 0 }
   0x3   :  { %13 = vsyncpa [#allocation11 + $0x1], 0 }
   0x4   :  { %14 = vsyncpa [#allocation6], 0  ;;  %s1542_s15 = smov 0   ;;  %s1544_s16 = smov 0  }
   0x5   :  { %s1546_s17 = smov 0   ;;  %s1548_s18 = smov 0  }
   0x6   :  { %s1550_s19 = smov 0   ;;  %s1552_s20 = smov 0  }
   0x7 LB: > { %s1020_s21 = sadd.s32 4294967295, %s1504_s20   ;;  %p145_p0 = scmp.ne.s32.totalorder %s1488_s16, %s1484_s15  ;;  %s1504_s20 = sphi %s1552_s20, %s20_s20   ;;  %s1500_s19 = sphi %s1550_s19, %s1888_s19   ;;  %s1496_s18 = sphi %s1548_s18, %s1887_s18   ;;  %s1492_s17 = sphi %s1546_s17, %s1886_s17   ;;  %s1488_s16 = sphi %s1544_s16, %s1885_s16   ;;  %s1484_s15 = sphi %s1542_s15, %s1884_s15  }
   0x8   : > { %p1574_p1 = scmp.eq.s32.totalorder %s1020_s21, 0  ;;  %p1021_p2 = scmp.ge.s32.totalorder %s1504_s20, 1 }
   0x9   : > { %p182_p3 = scmp.lt.s32.totalorder %s1504_s20, 4  ;;  %s1506_s25 = smov [#allocation7]  }
   0xa   : > { %p1582_p4 = por %p1574_p1, %p145_p0  ;;  %s215_s26 = sshll.u32 %s1506_s25, 4  ;;  %s216_s26 = int_to_ptr.vmem [resolvable:$true] %s215_s26 }
   0xb   : > { %p1586_p5 = pnand %p1021_p2, %p182_p3  ;;  %s1507_s28 = smov [#allocation4]  }
   0xc   : > { %s198_s29 = sshll.u32 %s1507_s28, 4  ;;  %s1323_s30 = scalar_lea.vmem %s216_s26, 2048  ;;  %s199_s29 = int_to_ptr.vmem [resolvable:$true] %s198_s29 }
   0xd   : > { %p1223_p6 = pneg %p1586_p5  ;;  %p1324_p9 = scmp.ne.s32.totalorder %s216_s26, %s1323_s30 }
   0xe   : > { %p1331_p12 = scmp.lt.s32.totalorder %s216_s26, %s216_s26  ;;  %p1332_p13 = scmp.lt.s32.totalorder %s1323_s30, %s1323_s30 }
   0xf   : > { %p1594_p7 = pnand %p1223_p6, %p1574_p1 }
  0x10   : > { %p1333_p0 = por %p1332_p13, %p1331_p12 }
  0x11   : > { %p1314_p8 = pneg %p1594_p7 }
  0x13   : > { %p1326_p10 = pnand %p1324_p9, %p1314_p8 }
  0x15   : > { %p1327_p11 = pneg %p1326_p10 }
  0x17   : > { %p1334_p2 = pnand %p1333_p0, %p1327_p11 }
  0x19   : > { %1337 = shalt.err (!%p1334_p2)
}
  0x1a   : > { %s1508_s5 = smov 128   ;;  %s1509_s6 = smov 8  }
  0x1b   : > { %1229 = dma.hbm_to_vmem [thread:$0]  (!%p1594_p7), %s1872_s1, 2048, %s216_s26, [#allocation8], %s1508_s5, %s1508_s5, %s1509_s6  }
  0x1c   : > { %s1349_s9 = scalar_lea.vmem %s199_s29, 1024  ;;  %p1357_p10 = scmp.lt.s32.totalorder %s199_s29, %s199_s29 }
  0x1d   : > { %p1350_p3 = scmp.ne.s32.totalorder %s199_s29, %s1349_s9  ;;  %p1358_p12 = scmp.lt.s32.totalorder %s1349_s9, %s1349_s9 }
  0x1f   : > { %p1352_p6 = pnand %p1350_p3, %p1314_p8  ;;  %p1359_p11 = por %p1358_p12, %p1357_p10 }
  0x21   : > { %p1353_p9 = pneg %p1352_p6 }
  0x23   : > { %p1360_p13 = pnand %p1359_p11, %p1353_p9 }
  0x25   : > { %1363 = shalt.err (!%p1360_p13)
}
  0x26   : > { %s1510_s10 = smov 64   ;;  %s1511_s11 = smov 4  }
  0x27   : > { %1226 = dma.hbm_to_vmem [thread:$0]  (!%p1594_p7), %s1871_s0, 1024, %s199_s29, [#allocation5], %s1510_s10, %s1510_s10, %s1511_s11  }
  0x28   : > { %s1512_s14 = smov [#allocation9]  }
  0x29   : > { %s228_s15 = sshll.u32 %s1512_s14, 4  ;;  %s229_s15 = int_to_ptr.vmem [resolvable:$true] %s228_s15 }
  0x2a   : > { %s1375_s25 = scalar_lea.vmem %s229_s15, 1024  ;;  %p1383_p6 = scmp.lt.s32.totalorder %s229_s15, %s229_s15 }
  0x2b   : > { %p1376_p0 = scmp.ne.s32.totalorder %s229_s15, %s1375_s25  ;;  %p1384_p9 = scmp.lt.s32.totalorder %s1375_s25, %s1375_s25 }
  0x2d   : > { %p1378_p2 = pnand %p1376_p0, %p1314_p8  ;;  %p1385_p10 = por %p1384_p9, %p1383_p6 }
  0x2f   : > { %p1379_p3 = pneg %p1378_p2 }
  0x31   : > { %p1386_p12 = pnand %p1385_p10, %p1379_p3 }
  0x33   : > { %1389 = shalt.err (!%p1386_p12)
}
  0x34   : > { %1232 = dma.hbm_to_vmem [thread:$0]  (!%p1594_p7), %s1873_s2, 1024, %s229_s15, [#allocation8], %s1510_s10, %s1510_s10, %s1511_s11  }
  0x35   : > { %s42_s29 = sadd.s32 1, %s1500_s19  ;;  %s132_s30 = sadd.s32 1, %s1492_s17 }
  0x36   : > { %p44_p8 = scmp.ge.s32.totalorder %s42_s29, 3  ;;  %p139_p11 = scmp.ne.s32.totalorder %s1492_s17, %s1488_s16 }
  0x37   : > { %p140_p13 = scmp.eq.s32.totalorder %s1504_s20, 0  ;;  %p1240_p2 = scmp.lt.s32.totalorder %s1504_s20, 3 }
  0x38   : > { %s1890_s29 = smov (%p44_p8, %s42_s29), 0  ;;  %s242_s5 = sand.u32 1, %s1492_s17  }
  0x39   : > { %p141_p0 = por %p140_p13, %p139_p11  ;;  %s127_s27 = ssub.s32 %s1500_s19, %s1890_s29 }
  0x3a   : > { %p130_p3 = scmp.eq.s32.totalorder %s127_s27, 0  ;;  %s1026_s6 = sshll.u32 %s242_s5, 3 }
  0x3b   : > { %s1027_s7 = sshll.u32 %s1500_s19, 7  ;;  %s246_s11 = scalar_lea.vmem [#allocation10], %s1026_s6 }
  0x3c   : > { %s1637_s8 = scalar_select %p130_p3, %s1492_s17, %s132_s30  }
  0x3d   : > { %s252_s10 = scalar_lea.hbm %s1874_s3, %s1027_s7  ;;  %s254_s13 = sshll.u32 %s246_s11, 4  ;;  %s255_s13 = int_to_ptr.vmem [resolvable:$true] %s254_s13 }
  0x3e   : > { %p1642_p7 = pnand %p1240_p2, %p141_p0  ;;  %s243_s15 = scalar_lea.sflag [#allocation11], %s242_s5 }
  0x3f   : > { %s1403_s25 = scalar_lea.vmem %s255_s13, 128  ;;  %s1513_s26 = smov [#allocation10]  }
  0x40   : > { %p1392_p6 = pneg %p1642_p7  ;;  %p1404_p9 = scmp.ne.s32.totalorder %s255_s13, %s1403_s25 }
  0x41   : > { %s1408_s28 = sshll.u32 %s1513_s26, 4  ;;  %s1409_s28 = int_to_ptr.vmem [resolvable:$false] %s1408_s28 }
  0x42   : > { %p1406_p10 = pnand %p1404_p9, %p1392_p6  ;;  %s1410_s30 = scalar_lea.vmem %s1409_s28, 256 }
  0x43   : > { %p1411_p8 = scmp.lt.s32.totalorder %s255_s13, %s1409_s28  ;;  %p1412_p11 = scmp.lt.s32.totalorder %s1410_s30, %s1403_s25 }
  0x44   : > { %p1407_p12 = pneg %p1406_p10 }
  0x45   : > { %p1413_p13 = por %p1412_p11, %p1411_p8 }
  0x47   : > { %p1414_p0 = pnand %p1413_p13, %p1407_p12 }
  0x49   : > { %1417 = shalt.err (!%p1414_p0)
}
  0x4a   : > { %1236 = dma.hbm_to_vmem [thread:$0]  (!%p1642_p7), %s252_s10, 128, %s255_s13, %s243_s15  }
  0x4b   : > { %263 = sbr.rel (%p1586_p5) target bundleno = 374 (0x176), region = 36 }
  0x50   : > { %1467 = dma.done.wait (%p1574_p1), [#allocation5], 1024  }
  0x51   : > { %1469 = vsyncadd (%p1574_p1), [#allocation5], 4294966272 }
  0x52   : > { %1471 = dma.done.wait (%p1574_p1), [#allocation8], 3072  }
  0x53   : > { %1473 = vsyncadd (%p1574_p1), [#allocation8], 4294964224  ;;  %s277_s27 = sand.u32 1, %s1488_s16  }
  0x54   : > { %s1661_s5 = sshll.u32 %s277_s27, 3  ;;  %s278_s24 = scalar_lea.sflag [#allocation11], %s277_s27 }
  0x55   : > { %s281_s6 = scalar_lea.vmem [#allocation10], %s1661_s5 }
  0x56   : > { %1475 = dma.done.wait (%p1582_p4), %s278_s24, 128  }
  0x57   : > { %1477 = vsyncadd (%p1582_p4), %s278_s24, 4294967168  ;;  %p304_p5 = scmp.lt.s32.totalorder %s1496_s18, 0  ;;  %s305_s22 = ssub.s32 0, %s1496_s18  ;;  %v1304_v0 = vld [vmem:[#allocation9] sm:$0xff]   ;;  %v374_v3 = vld [vmem:[#allocation4 + $0x38] sm:$0xf] }
  0x58   : > { %s1033_s7 = smin.u32 %s1496_s18, %s305_s22  ;;  %p359_p1 = scmp.eq.s32.totalorder %s1496_s18, 0  ;;  %1173 = vmatprep.mubr.bf16.mxu0 %v1304_v0  ;;  %v1305_v2 = vld [vmem:[#allocation9 + $0x20] sm:$0xff]   ;;  %v375_v4 = vld [vmem:[#allocation4 + $0x3c] sm:$0xf]  ;;  %v372_v6 = vld [vmem:[#allocation4 + $0x30] sm:$0xf] }
  0x59   : > { %s307_s9 = sand.u32 1, %s1033_s7   ;;  %v373_v7 = vld [vmem:[#allocation4 + $0x34] sm:$0xf]  ;;  %1181 = vmatprep.mubr.bf16.mxu1 %v1305_v2  ;;  %v370_v8 = vld [vmem:[#allocation4 + $0x28] sm:$0xf]  ;;  %v1310_v0 = vld [vmem:[#allocation9 + $0x18] sm:$0xff]  }
  0x5a   : > { %s308_s12 = ssub.s32 0, %s307_s9  ;;  %v371_v9 = vld [vmem:[#allocation4 + $0x2c] sm:$0xf]  ;;  %v368_v24 = vld [vmem:[#allocation4 + $0x20] sm:$0xf]  ;;  %v1308_v62 = vld [vmem:[#allocation9 + $0x10] sm:$0xff]  }
  0x5b   : > { %s1892_s12 = smov (!%p304_p5, %s308_s12), %s307_s9  ;;  %v369_v27 = vld [vmem:[#allocation4 + $0x24] sm:$0xf]  ;;  %v366_v31 = vld [vmem:[#allocation4 + $0x18] sm:$0xf]  ;;  %v367_v32 = vld [vmem:[#allocation4 + $0x1c] sm:$0xf] }
  0x5c   : > { %s376_s10 = scalar_select %p359_p1, 1, 0  ;;  %v364_v38 = vld [vmem:[#allocation4 + $0x10] sm:$0xf]  ;;  %v365_v41 = vld [vmem:[#allocation4 + $0x14] sm:$0xf] }
  0x5d   : > { %p1035_p2 = scmp.lt.s32.totalorder %s1892_s12, 0  ;;  %s314_s11 = sadd.s32 2, %s1892_s12  ;;  %v362_v45 = vld [vmem:[#allocation4 + $0x8] sm:$0xf]  ;;  %v363_v48 = vld [vmem:[#allocation4 + $0xc] sm:$0xf] }
  0x5e   : > { %v377_v1 = vstv %s376_s10  ;;  %v360_v52 = vld [vmem:[#allocation4] sm:$0xf]  ;;  %v361_v55 = vld [vmem:[#allocation4 + $0x4] sm:$0xf]  ;;  %v1306_v60 = vld [vmem:[#allocation9 + $0x8] sm:$0xff]   ;;  %p1055_p4 = scmp.ge.s32.totalorder %s1496_s18, 2 }
  0x5f   : > { %s1894_s11 = smov (!%p1035_p2, %s314_s11), %s1892_s12  ;;  %vm1675_vm0 = vcmp.eq.s32.totalorder %v377_v1, 1  ;;  %v1307_v61 = vld [vmem:[#allocation9 + $0x28] sm:$0xff]   ;;  %v1309_v63 = vld [vmem:[#allocation9 + $0x30] sm:$0xff]   ;;  %v1311_v1 = vld [vmem:[#allocation9 + $0x38] sm:$0xff]  }
  0x60   : > { %s1036_s23 = sshll.u32 %s1894_s11, 7  ;;  %v1054_v2 = vld [vmem:[%s281_s6] ss:$0 sm:$0xff]  ;;  %s704_s25 = ssub.s32 (!%p1055_p4), 1, %s1894_s11 }
  0x61   : > { %s339_s13 = sshra.s32 %s1036_s23, 3  ;;  %s1056_s26 = sshll.u32 (!%p1055_p4), %s704_s25, 7 }
  0x62   : > { %s1037_s14 = sshll.u32 %s339_s13, 2  ;;  %s772_s28 = sshra.s32 (!%p1055_p4), %s1056_s26, 3 }
  0x63   : > { %s1679_s15 = scalar_lea.vmem [#allocation3], %s1037_s14  ;;  %s1073_s30 = sshll.u32 (!%p1055_p4), %s772_s28, 2 }
  0x64   : > { %v357_v10 = vld [vmem:[%s1679_s15 + $0x38] sm:$0xf]  ;;  %v358_v11 = vld [vmem:[%s1679_s15 + $0x3c] sm:$0xf]  ;;  %v355_v12 = vld [vmem:[%s1679_s15 + $0x30] sm:$0xf] }
  0x65   : > { %v393_v13 = vsel %vm1675_vm0, %v374_v3, %v357_v10  ;;  %v394_v14 = vsel %vm1675_vm0, %v375_v4, %v358_v11  ;;  %v356_v15 = vld [vmem:[%s1679_s15 + $0x34] sm:$0xf]  ;;  %v391_v16 = vsel %vm1675_vm0, %v372_v6, %v355_v12  ;;  %v353_v17 = vld [vmem:[%s1679_s15 + $0x28] sm:$0xf]  ;;  %v354_v18 = vld [vmem:[%s1679_s15 + $0x2c] sm:$0xf] }
  0x66   : > { %v1053_v19 = vcombine.low %v393_v13, %v394_v14  ;;  %v392_v20 = vsel %vm1675_vm0, %v373_v7, %v356_v15  ;;  %v389_v22 = vsel %vm1675_vm0, %v370_v8, %v353_v17  ;;  %v390_v23 = vsel %vm1675_vm0, %v371_v9, %v354_v18  ;;  %v351_v25 = vld [vmem:[%s1679_s15 + $0x20] sm:$0xf]  ;;  %v352_v26 = vld [vmem:[%s1679_s15 + $0x24] sm:$0xf]  ;;  %v349_v29 = vld [vmem:[%s1679_s15 + $0x18] sm:$0xf] }
  0x67   : > { %v1052_v21 = vcombine.low %v391_v16, %v392_v20  ;;  %v1051_v28 = vcombine.low %v389_v22, %v390_v23  ;;  %v350_v30 = vld [vmem:[%s1679_s15 + $0x1c] sm:$0xf]  ;;  %v387_v33 = vsel %vm1675_vm0, %v368_v24, %v351_v25  ;;  %v388_v34 = vsel %vm1675_vm0, %v369_v27, %v352_v26  ;;  %v347_v39 = vld [vmem:[%s1679_s15 + $0x10] sm:$0xf]  ;;  %v348_v40 = vld [vmem:[%s1679_s15 + $0x14] sm:$0xf] }
  0x68   : > { %1157 = vmatprep.subr.bf16.mxu0 %v1053_v19  ;;  %1189 = vmatprep.subr.bf16.mxu1 %v1053_v19  ;;  %v1050_v35 = vcombine.low %v387_v33, %v388_v34  ;;  %v385_v36 = vsel %vm1675_vm0, %v366_v31, %v349_v29  ;;  %v386_v37 = vsel %vm1675_vm0, %v367_v32, %v350_v30  ;;  %v345_v46 = vld [vmem:[%s1679_s15 + $0x8] sm:$0xf]  ;;  %v346_v47 = vld [vmem:[%s1679_s15 + $0xc] sm:$0xf]  ;;  %v343_v53 = vld [vmem:[%s1679_s15] sm:$0xf] }
  0x69   : > { %1158 = vmatpush3.bf16.msra.mxu0 %v1053_v19  ;;  %1197 = vmatpush3.bf16.msra.mxu1 %v1053_v19  ;;  %v1049_v42 = vcombine.low %v385_v36, %v386_v37  ;;  %v383_v43 = vsel %vm1675_vm0, %v364_v38, %v347_v39  ;;  %v384_v44 = vsel %vm1675_vm0, %v365_v41, %v348_v40  ;;  %v344_v54 = vld [vmem:[%s1679_s15 + $0x4] sm:$0xf]  ;;  %s775_s27 = scalar_lea.vmem (!%p1055_p4), [#allocation3], %s1073_s30 }
  0x6a   : > { %1159 = vmatprep.subr.bf16.mxu0 %v1052_v21  ;;  %1190 = vmatprep.subr.bf16.mxu1 %v1052_v21  ;;  %v1048_v49 = vcombine.low %v383_v43, %v384_v44  ;;  %v381_v50 = vsel %vm1675_vm0, %v362_v45, %v345_v46  ;;  %v382_v51 = vsel %vm1675_vm0, %v363_v48, %v346_v47 }
  0x6b   : > { %v1047_v56 = vcombine.low %v381_v50, %v382_v51  ;;  %v379_v57 = vsel %vm1675_vm0, %v360_v52, %v343_v53  ;;  %v380_v58 = vsel %vm1675_vm0, %v361_v55, %v344_v54 }
  0x6c   : > { %v1046_v59 = vcombine.low %v379_v57, %v380_v58 }
  0x6d   : > { %1160 = vmatpush3.bf16.msra.mxu0 %v1052_v21  ;;  %1198 = vmatpush3.bf16.msra.mxu1 %v1052_v21 }
  0x6e   : > { %1161 = vmatprep.subr.bf16.mxu0 %v1051_v28  ;;  %1191 = vmatprep.subr.bf16.mxu1 %v1051_v28 }
  0x71   : > { %1162 = vmatpush3.bf16.msra.mxu0 %v1051_v28  ;;  %1199 = vmatpush3.bf16.msra.mxu1 %v1051_v28 }
  0x72   : > { %1163 = vmatprep.subr.bf16.mxu0 %v1050_v35  ;;  %1192 = vmatprep.subr.bf16.mxu1 %v1050_v35 }
  0x75   : > { %1164 = vmatpush3.bf16.msra.mxu0 %v1050_v35  ;;  %1200 = vmatpush3.bf16.msra.mxu1 %v1050_v35 }
  0x76   : > { %1165 = vmatprep.subr.bf16.mxu0 %v1049_v42  ;;  %1193 = vmatprep.subr.bf16.mxu1 %v1049_v42 }
  0x79   : > { %1166 = vmatpush3.bf16.msra.mxu0 %v1049_v42  ;;  %1201 = vmatpush3.bf16.msra.mxu1 %v1049_v42 }
  0x7a   : > { %1167 = vmatprep.subr.bf16.mxu0 %v1048_v49  ;;  %1194 = vmatprep.subr.bf16.mxu1 %v1048_v49 }
  0x7d   : > { %1168 = vmatpush3.bf16.msra.mxu0 %v1048_v49  ;;  %1202 = vmatpush3.bf16.msra.mxu1 %v1048_v49 }
  0x7e   : > { %1169 = vmatprep.subr.bf16.mxu0 %v1047_v56  ;;  %1195 = vmatprep.subr.bf16.mxu1 %v1047_v56 }
  0x81   : > { %1170 = vmatpush3.bf16.msra.mxu0 %v1047_v56  ;;  %1203 = vmatpush3.bf16.msra.mxu1 %v1047_v56 }
  0x82   : > { %1171 = vmatprep.subr.bf16.mxu0 %v1046_v59  ;;  %1196 = vmatprep.subr.bf16.mxu1 %v1046_v59 }
  0x85   : > { %1172 = vmatpush3.bf16.msra.mxu0 %v1046_v59  ;;  %1204 = vmatpush3.bf16.msra.mxu1 %v1046_v59 }
  0x88   : > { %1174 = vmatmul.mubr.bf16.vlgmr.msra.gmra.mxu0 %v1306_v60  ;;  %1182 = vmatmul.mubr.bf16.vlgmr.msra.gmra.mxu1 %v1307_v61 }
  0x89   : > { %1177 = vmatprep.mubr.bf16.mxu0 %v1308_v62  ;;  %1185 = vmatprep.mubr.bf16.mxu1 %v1309_v63 }
  0x90   : > { %1178 = vmatmul.mubr.bf16.gmra.mxu0 %v1310_v0  ;;  %1186 = vmatmul.mubr.bf16.gmra.mxu1 %v1311_v1 }
 0x148   : > { %v1175_v3 = vpop.f32.mrf.mxu0  ;;  %v1183_v4 = vpop.f32.mrf.mxu1 }
 0x149   : > { %v1731_v6 = vadd.f32 %v1175_v3, %v1054_v2  ;;  %v1733_v7 = vadd.f32 %v1183_v4, %v1054_v2 }
 0x14a   : > { %v525_v8 = vpop.f32.mrf.mxu0  ;;  %v557_v9 = vpop.f32.mrf.mxu1 }
 0x14b   : > { %v684_v10 = vadd.f32 %v1054_v2, %v525_v8  ;;  %v1735_v11 = vadd.f32 %v1054_v2, %v557_v9 }
 0x14c   : > { %v1176_v12 = vpop.f32.mrf.mxu0  ;;  %v1184_v13 = vpop.f32.mrf.mxu1 }
 0x14d   : > { %v1737_v14 = vadd.f32 %v1176_v12, %v1054_v2  ;;  %v1739_v15 = vadd.f32 %v1184_v13, %v1054_v2 }
 0x14e   : > { %v528_v16 = vpop.f32.mrf.mxu0  ;;  %v560_v17 = vpop.f32.mrf.mxu1 }
 0x14f   : > { %v685_v18 = vadd.f32 %v1054_v2, %v528_v16  ;;  %v1741_v19 = vadd.f32 %v1054_v2, %v560_v17 }
 0x150   : > { %v1179_v20 = vpop.f32.mrf.mxu0  ;;  %v1187_v21 = vpop.f32.mrf.mxu1 }
 0x151   : > { %v1743_v22 = vadd.f32 %v1179_v20, %v1054_v2  ;;  %v1745_v23 = vadd.f32 %v1187_v21, %v1054_v2 }
 0x152   : > { %v541_v24 = vpop.f32.mrf.mxu0  ;;  %v573_v25 = vpop.f32.mrf.mxu1 }
 0x153   : > { %v1747_v26 = vadd.f32 %v1054_v2, %v541_v24  ;;  %v1749_v27 = vadd.f32 %v1054_v2, %v573_v25  ;;  %703 = sbr.rel (%p1055_p4) target bundleno = 350 (0x15e), region = 68 }
 0x154   : > { %v1180_v28 = vpop.f32.mrf.mxu0  ;;  %v1188_v29 = vpop.f32.mrf.mxu1 }
 0x155   : > { %v1751_v30 = vadd.f32 %v1180_v28, %v1054_v2  ;;  %v1753_v31 = vadd.f32 %v1188_v29, %v1054_v2 }
 0x156   : > { %v544_v32 = vpop.f32.mrf.mxu0  ;;  %v576_v33 = vpop.f32.mrf.mxu1 }
 0x157   : > { %v689_v34 = vadd.f32 %v1054_v2, %v544_v32  ;;  %v1755_v35 = vadd.f32 %v1054_v2, %v576_v33 }
 0x158   : > { %v1097_v36 = vpack.c.bf16 %v685_v18, %v684_v10  ;;  %v1102_v37 = vpack.c.bf16 %v1737_v14, %v1731_v6  ;;  %v1112_v39 = vpack.c.bf16 %v1751_v30, %v1743_v22  ;;  %v1117_v40 = vpack.c.bf16 %v1741_v19, %v1735_v11 }
 0x159   : > { %v1107_v38 = vpack.c.bf16 %v689_v34, %v1747_v26  ;;  %v1122_v41 = vpack.c.bf16 %v1739_v15, %v1733_v7  ;;  %v1127_v42 = vpack.c.bf16 %v1755_v35, %v1749_v27  ;;  %v1132_v43 = vpack.c.bf16 %v1753_v31, %v1745_v23 }
 0x15a   : > { %1098 = vst [vmem:[%s775_s27] sm:$0xff] %v1097_v36   ;;  %1134 = vst [vmem:[%s775_s27 + $0x8] sm:$0xff] %v1102_v37  }
 0x15b   : > { %1135 = vst [vmem:[%s775_s27 + $0x10] sm:$0xff] %v1107_v38   ;;  %1136 = vst [vmem:[%s775_s27 + $0x18] sm:$0xff] %v1112_v39  }
 0x15c   : > { %1137 = vst [vmem:[%s775_s27 + $0x20] sm:$0xff] %v1117_v40   ;;  %1138 = vst [vmem:[%s775_s27 + $0x28] sm:$0xff] %v1122_v41  }
 0x15d   : > { %1139 = vst [vmem:[%s775_s27 + $0x30] sm:$0xff] %v1127_v42   ;;  %1140 = vst [vmem:[%s775_s27 + $0x38] sm:$0xff] %v1132_v43  }
 0x15e PF: > { %v794_v44 = vld [vmem:[#allocation12] sm:$0xff]  ;;  %v810_v45 = vld [vmem:[#allocation7] sm:$0xff]  ;;  %p842_p3 = scmp.eq.s32.totalorder %s1496_s18, 2  ;;  %v795_v46 = vld [vmem:[#allocation12 + $0x8] sm:$0xff]  ;;  %s1514_s18 = smov [#allocation12]  }
 0x15f   : > { %v826_v47 = vsel %vm1675_vm0, %v810_v45, %v794_v44  ;;  %v811_v48 = vld [vmem:[#allocation7 + $0x8] sm:$0xff]  ;;  %v796_v49 = vld [vmem:[#allocation12 + $0x10] sm:$0xff]  ;;  %v812_v50 = vld [vmem:[#allocation7 + $0x10] sm:$0xff]  ;;  %s901_s24 = sshll.u32 %s1514_s18, 4  ;;  %p1836_p7 = scmp.eq.s32.totalorder %s1020_s21, 2  ;;  %s902_s24 = int_to_ptr.vmem [resolvable:$true] %s901_s24 }
 0x160   : > { %s843_s5 = scalar_select %p842_p3, 0.25, 1.0  ;;  %v844_v51 = vadd.f32 %v826_v47, %v684_v10  ;;  %v827_v52 = vsel %vm1675_vm0, %v811_v48, %v795_v46  ;;  %v828_v53 = vsel %vm1675_vm0, %v812_v50, %v796_v49  ;;  %v797_v54 = vld [vmem:[#allocation12 + $0x18] sm:$0xff]  ;;  %v813_v55 = vld [vmem:[#allocation7 + $0x18] sm:$0xff]  ;;  %v798_v56 = vld [vmem:[#allocation12 + $0x20] sm:$0xff] }
 0x161   : > { %v845_v57 = vadd.f32 %v827_v52, %v685_v18  ;;  %v846_v58 = vadd.f32 %v828_v53, %v1731_v6  ;;  %v829_v59 = vsel %vm1675_vm0, %v813_v55, %v797_v54  ;;  %v814_v60 = vld [vmem:[#allocation7 + $0x20] sm:$0xff]  ;;  %v799_v61 = vld [vmem:[#allocation12 + $0x28] sm:$0xff]  ;;  %v815_v62 = vld [vmem:[#allocation7 + $0x28] sm:$0xff]  ;;  %s1418_s22 = scalar_lea.vmem %s902_s24, 2048  ;;  %p1425_p12 = scmp.lt.s32.totalorder %s902_s24, %s902_s24 }
 0x162   : > { %v1782_v63 = vstv %s843_s5  ;;  %v847_v0 = vadd.f32 %v829_v59, %v1737_v14  ;;  %v830_v1 = vsel %vm1675_vm0, %v814_v60, %v798_v56  ;;  %v831_v2 = vsel %vm1675_vm0, %v815_v62, %v799_v61  ;;  %v800_v3 = vld [vmem:[#allocation12 + $0x30] sm:$0xff]  ;;  %v816_v4 = vld [vmem:[#allocation7 + $0x30] sm:$0xff]  ;;  %v801_v8 = vld [vmem:[#allocation12 + $0x38] sm:$0xff]  ;;  %p1419_p6 = scmp.ne.s32.totalorder %s902_s24, %s1418_s22  ;;  %p1426_p8 = scmp.lt.s32.totalorder %s1418_s22, %s1418_s22 }
 0x163   : > { %v861_v6 = vmul.f32 %v1782_v63, %v844_v51  ;;  %v862_v9 = vmul.f32 %v1782_v63, %v845_v57  ;;  %v863_v10 = vmul.f32 %v1782_v63, %v846_v58  ;;  %v848_v12 = vadd.f32 %v830_v1, %v1747_v26  ;;  %v817_v13 = vld [vmem:[#allocation7 + $0x38] sm:$0xff]  ;;  %v802_v16 = vld [vmem:[#allocation12 + $0x40] sm:$0xff]  ;;  %v818_v14 = vld [vmem:[#allocation7 + $0x40] sm:$0xff] }
 0x164   : > { %v864_v17 = vmul.f32 %v1782_v63, %v847_v0  ;;  %v849_v18 = vadd.f32 %v831_v2, %v689_v34  ;;  %v832_v20 = vsel %vm1675_vm0, %v816_v4, %v800_v3  ;;  %v833_v21 = vsel %vm1675_vm0, %v817_v13, %v801_v8  ;;  %v803_v24 = vld [vmem:[#allocation12 + $0x48] sm:$0xff]  ;;  %v819_v25 = vld [vmem:[#allocation7 + $0x48] sm:$0xff]  ;;  %v804_v28 = vld [vmem:[#allocation12 + $0x50] sm:$0xff]  ;;  %p1420_p9 = pnand %p1419_p6, %p1836_p7  ;;  %p1427_p11 = por %p1426_p8, %p1425_p12 }
 0x165   : > { %877 = vst [vmem:[#allocation12] sm:$0xff] %v861_v6  ;;  %878 = vst [vmem:[#allocation12 + $0x8] sm:$0xff] %v862_v9  ;;  %v865_v26 = vmul.f32 %v1782_v63, %v848_v12  ;;  %v850_v29 = vadd.f32 %v832_v20, %v1743_v22  ;;  %v851_v32 = vadd.f32 %v833_v21, %v1751_v30  ;;  %v820_v34 = vld [vmem:[#allocation7 + $0x50] sm:$0xff]  ;;  %v805_v36 = vld [vmem:[#allocation12 + $0x58] sm:$0xff] }
 0x166   : > { %879 = vst [vmem:[#allocation12 + $0x10] sm:$0xff] %v863_v10  ;;  %v834_v33 = vsel %vm1675_vm0, %v818_v14, %v802_v16  ;;  %v821_v37 = vld [vmem:[#allocation7 + $0x58] sm:$0xff]  ;;  %880 = vst [vmem:[#allocation12 + $0x18] sm:$0xff] %v864_v17  ;;  %v866_v38 = vmul.f32 %v1782_v63, %v849_v18  ;;  %v835_v40 = vsel %vm1675_vm0, %v819_v25, %v803_v24  ;;  %v806_v22 = vld [vmem:[#allocation12 + $0x60] sm:$0xff]  ;;  %p1421_p10 = pneg %p1420_p9 }
 0x167   : > { %v852_v39 = vadd.f32 %v834_v33, %v1735_v11  ;;  %v836_v41 = vsel %vm1675_vm0, %v820_v34, %v804_v28  ;;  %v822_v42 = vld [vmem:[#allocation7 + $0x60] sm:$0xff]  ;;  %v807_v30 = vld [vmem:[#allocation12 + $0x68] sm:$0xff]  ;;  %881 = vst [vmem:[#allocation12 + $0x20] sm:$0xff] %v865_v26  ;;  %v867_v43 = vmul.f32 %v1782_v63, %v850_v29  ;;  %v868_v44 = vmul.f32 %v1782_v63, %v851_v32  ;;  %v823_v47 = vld [vmem:[#allocation7 + $0x68] sm:$0xff] }
 0x168   : > { %v853_v45 = vadd.f32 %v835_v40, %v1741_v19  ;;  %v854_v46 = vadd.f32 %v836_v41, %v1733_v7  ;;  %v808_v11 = vld [vmem:[#allocation12 + $0x70] sm:$0xff]  ;;  %v824_v48 = vld [vmem:[#allocation7 + $0x70] sm:$0xff]  ;;  %882 = vst [vmem:[#allocation12 + $0x28] sm:$0xff] %v866_v38  ;;  %v837_v50 = vsel %vm1675_vm0, %v821_v37, %v805_v36  ;;  %v838_v51 = vsel %vm1675_vm0, %v822_v42, %v806_v22  ;;  %v809_v53 = vld [vmem:[#allocation12 + $0x78] sm:$0xff]  ;;  %p1428_p13 = pnand %p1427_p11, %p1421_p10 }
 0x169   : > { %v869_v49 = vmul.f32 %v1782_v63, %v852_v39  ;;  %v839_v52 = vsel %vm1675_vm0, %v823_v47, %v807_v30  ;;  %v825_v54 = vld [vmem:[#allocation7 + $0x78] sm:$0xff]  ;;  %883 = vst [vmem:[#allocation12 + $0x30] sm:$0xff] %v867_v43  ;;  %884 = vst [vmem:[#allocation12 + $0x38] sm:$0xff] %v868_v44  ;;  %v855_v55 = vadd.f32 %v837_v50, %v1739_v15 }
 0x16a   : > { %v870_v7 = vmul.f32 %v1782_v63, %v853_v45  ;;  %v871_v19 = vmul.f32 %v1782_v63, %v854_v46  ;;  %v856_v56 = vadd.f32 %v838_v51, %v1749_v27  ;;  %v857_v57 = vadd.f32 %v839_v52, %v1755_v35 }
 0x16b   : > { %885 = vst [vmem:[#allocation12 + $0x40] sm:$0xff] %v869_v49  ;;  %v840_v58 = vsel %vm1675_vm0, %v824_v48, %v808_v11  ;;  %v841_v59 = vsel %vm1675_vm0, %v825_v54, %v809_v53  ;;  %v872_v60 = vmul.f32 %v1782_v63, %v855_v55 }
 0x16c   : > { %886 = vst [vmem:[#allocation12 + $0x48] sm:$0xff] %v870_v7  ;;  %887 = vst [vmem:[#allocation12 + $0x50] sm:$0xff] %v871_v19  ;;  %v873_v61 = vmul.f32 %v1782_v63, %v856_v56  ;;  %v858_v15 = vadd.f32 %v840_v58, %v1745_v23  ;;  %v859_v27 = vadd.f32 %v841_v59, %v1753_v31 }
 0x16d   : > { %v874_v35 = vmul.f32 %v1782_v63, %v857_v57  ;;  %888 = vst [vmem:[#allocation12 + $0x58] sm:$0xff] %v872_v60 }
 0x16e   : > { %889 = vst [vmem:[#allocation12 + $0x60] sm:$0xff] %v873_v61  ;;  %v875_v5 = vmul.f32 %v1782_v63, %v858_v15  ;;  %v876_v62 = vmul.f32 %v1782_v63, %v859_v27 }
 0x16f   : > { %890 = vst [vmem:[#allocation12 + $0x68] sm:$0xff] %v874_v35 }
 0x170   : > { %891 = vst [vmem:[#allocation12 + $0x70] sm:$0xff] %v875_v5  ;;  %892 = vst [vmem:[#allocation12 + $0x78] sm:$0xff] %v876_v62 }
 0x171   : > { %1431 = shalt.err (!%p1428_p13)
}
 0x172   : > { %s1515_s21 = smov 128   ;;  %s1516_s7 = smov 8  }
 0x173   : > { %1220 = dma.vmem_to_hbm [thread:$0]  (%p1836_p7), %s902_s24, 2048, %s1875_s4, [#allocation6], %s1515_s21, %s1515_s21, %s1516_s7  }
 0x174   : > { %1479 = dma.done.wait (%p1836_p7), [#allocation6], 2048  }
 0x175   : > { %1481 = vsyncadd (%p1836_p7), [#allocation6], 4294965248 }
 0x176 PF: > { %s20_s20 = sadd.s32 1, %s1504_s20   ;;  %s1884_s15 = smov %s1488_s16 }
 0x177   : > { %p17_p0 = scmp.ge.s32.totalorder %s20_s20, 5   ;;  %s1885_s16 = smov %s1492_s17 }
 0x178   : > { %s1886_s17 = smov %s1637_s8  ;;  %s1887_s18 = smov %s1500_s19 }
 0x179   : > { %s1888_s19 = smov %s1890_s29  ;;  %19 = sbr.rel (!%p17_p0) target bundleno = 7 (0x7), region = 109 }
 0x17e   :  { %917 = vsyncpa [#allocation5], 1 }
 0x17f   :  { %919 = vsyncpa [#allocation5 + $0x1], 1 }
 0x180   :  { %920 = vsyncpa [#allocation8], 1 }
 0x181   :  { %921 = vsyncpa [#allocation11], 1 }
 0x182   :  { %923 = vsyncpa [#allocation11 + $0x1], 1 }
 0x183   :  { %924 = vsyncpa [#allocation6], 1 }
 0x184   :  { %926 = vsyncpa [#allocation6 + $0x1], 1 }

</bundles_post_ra>
